<compile_context>
chip_gen: v6e
topology: v6e:2x2x1
jax: 0.10.0
libtpu: 0.0.40
codegen_flags: <defaults>
</compile_context>

<pallas_src>
import jax
import jax.numpy as jnp
from jax.experimental import pallas as pl
from jax.experimental.pallas import tpu as pltpu

LANES = 128
NEG_INF = -1e30


def _round8(r):
    return (r + 7) // 8 * 8


# ----------------------------- fused Pallas kernel ------------------------------


def _make_encoder_kernel(meta):
    n = meta["num_nodes"]
    heads = meta["heads"]
    f_out = meta["f_out"]
    hf = heads * f_out
    hn = heads * n
    d_model = meta["d_model"]
    off = meta["offsets"]
    f_ins = meta["f_ins"]

    def kernel(x_ref, adj_ref, slab_ref, o_ref):
        # ---- static views into the single parameter slab (loaded once, reused across the batch) ----
        blk_sum = slab_ref[off["blk_sum"]:off["blk_sum"] + hn, 0:hn]   # [HN,HN] ones within each head block
        diag_sel = slab_ref[off["diag"]:off["diag"] + n, 0:hn]         # [N,HN]  (j == j') selector per block
        bd_mask = slab_ref[off["bd"]:off["bd"] + hn, 0:hf]             # [HN,HF] block-diag feature mask

        # ---- per-graph additive edge mask, directly in the lane-packed [N, H*N] layout ----
        # adj_p[i, h*N + j] = adj[i, j]   (one small MXU matmul; no lane-tile relayout)
        adj_p = jnp.dot(adj_ref[...], diag_sel, preferred_element_type=jnp.float32)
        adj_bias = jnp.where(adj_p > 0.0, 0.0, NEG_INF)                # 0 on edges (incl. self loops)

        x = x_ref[...]                                                 # [N, F_in0]
        for l, f_in in enumerate(f_ins):
            w = slab_ref[off["w"][l]:off["w"][l] + f_in, 0:hf]                     # [F_in, HF]
            score_w = slab_ref[off["score"][l]:off["score"][l] + hf, 0:2 * hn]     # [HF, 2*HN]
            bias = slab_ref[off["bias"][l]:off["bias"][l] + 1, 0:hf]               # [1, HF]

            xp = jnp.dot(x, w, preferred_element_type=jnp.float32)                 # [N, HF]    (MXU)

            # One fused MXU matmul for both attention terms, pre-expanded over head blocks:
            #   sc[i, h*N+j]        = a_dst[i, h]
            #   sc[i, HN + h*N+j]   = a_src[i, h]
            sc = jnp.dot(xp, score_w, preferred_element_type=jnp.float32)          # [N, 2*HN]
            d_exp = sc[:, 0:hn]
            # place a_src[j, h] onto lane h*N+j: diagonal select + sublane sum (no transpose/reshape)
            s_row = jnp.sum(sc[:, hn:2 * hn] * diag_sel, axis=0, keepdims=True)    # [1, HN]

            e = d_exp + s_row                                   # e[i, h*N+j] = a_dst[i,h] + a_src[j,h]
            e = jnp.where(e >= 0.0, e, 0.2 * e) + adj_bias      # LeakyReLU(0.2), then edge mask
            # per-row max is constant within every head block -> exact per-(i,h) softmax stabilizer
            m = jnp.max(e, axis=-1, keepdims=True)              # [N, 1]
            p = jnp.exp(e - m)                                  # [N, HN]
            denom = jnp.dot(p, blk_sum, preferred_element_type=jnp.float32)        # per-(i,h) sums
            alpha = p * pl.reciprocal(denom, approx=True)       # [N, HN]

            # head-blocked aggregation as one well-shaped MXU matmul
            xp_bd = jnp.tile(xp, (heads, 1)) * bd_mask          # [HN, HF] block-diag copy of xp
            out = jnp.dot(alpha, xp_bd, preferred_element_type=jnp.float32) + bias
            x = jnp.maximum(out, 0.0)                           # ReLU (dropout = identity in eval)

        # ---- global mean pool (batch=None path) -> output_proj -> LayerNorm(eps=1e-5) ----
        pooled = jnp.mean(x, axis=0, keepdims=True)                                # [1, HF]
        proj_w = slab_ref[off["proj_w"]:off["proj_w"] + hf, 0:d_model]             # [HF, D]
        pbg = slab_ref[off["pbg"]:off["pbg"] + 3, 0:d_model]                       # proj_b / gamma / beta
        y = jnp.dot(pooled, proj_w, preferred_element_type=jnp.float32) + pbg[0:1, :]
        mu = jnp.mean(y, axis=-1, keepdims=True)
        var = jnp.mean((y - mu) ** 2, axis=-1, keepdims=True)                      # biased, like nn.LayerNorm
        o_ref[...] = pbg[1:2, :] * (y - mu) * jax.lax.rsqrt(var + 1e-5) + pbg[2:3, :]

    return kernel


# ------------------------ one-time parameter packing -----------------------------


def pack_params(params, num_nodes):
    """Pack all weights + constant masks into ONE [rows,128] f32 slab (done once at
    parameter-load time).  Returns (slab, meta) where meta holds static row offsets."""
    heads, f_out = params["gat_layers"][0]["att_src"].shape
    hf = heads * f_out
    hn = heads * num_nodes
    d_model = params["proj_w"].shape[1]
    assert 2 * hn <= LANES and hf <= LANES and d_model <= LANES, (
        "single-plane layout needs heads*N <= 64 and HF, d_model <= 128; see TODO(synk) header note")

    eye_h = jnp.eye(heads, dtype=jnp.float32)
    sections = []
    offsets = {"w": [], "score": [], "bias": []}
    f_ins = []
    rows = 0

    def add(arr):
        nonlocal rows
        arr = jnp.asarray(arr, jnp.float32)
        r0 = rows
        padded = jnp.zeros((_round8(arr.shape[0]), LANES), jnp.float32)
        padded = padded.at[:arr.shape[0], :arr.shape[1]].set(arr)
        sections.append(padded)
        rows += padded.shape[0]
        return r0

    for layer in params["gat_layers"]:
        w = layer["w"]
        f_ins.append(int(w.shape[0]))
        offsets["w"].append(add(w))
        # block-diagonal attention vectors [HF, H], then expanded over the N lanes of each head block
        att_dst_bd = (layer["att_dst"][:, :, None] * eye_h[:, None, :]).reshape(hf, heads)
        att_src_bd = (layer["att_src"][:, :, None] * eye_h[:, None, :]).reshape(hf, heads)
        w_dst_exp = jnp.repeat(att_dst_bd, num_nodes, axis=1)                  # [HF, HN]
        w_src_exp = jnp.repeat(att_src_bd, num_nodes, axis=1)                  # [HF, HN]
        offsets["score"].append(add(jnp.concatenate([w_dst_exp, w_src_exp], axis=1)))   # [HF, 2*HN]
        offsets["bias"].append(add(layer["bias"].reshape(1, hf)))

    offsets["blk_sum"] = add(jnp.kron(eye_h, jnp.ones((num_nodes, num_nodes), jnp.float32)))  # [HN,HN]
    offsets["diag"] = add(jnp.tile(jnp.eye(num_nodes, dtype=jnp.float32), (1, heads)))        # [N, HN]
    offsets["bd"] = add(jnp.kron(eye_h, jnp.ones((num_nodes, f_out), jnp.float32)))           # [HN,HF]
    offsets["proj_w"] = add(params["proj_w"])
    offsets["pbg"] = add(jnp.concatenate([params["proj_b"].reshape(1, -1),
                                          params["ln_gamma"].reshape(1, -1),
                                          params["ln_beta"].reshape(1, -1)], axis=0))

    slab = jnp.concatenate(sections, axis=0)
    meta = {"num_nodes": int(num_nodes), "heads": int(heads), "f_out": int(f_out),
            "d_model": int(d_model), "f_ins": tuple(f_ins), "offsets": offsets,
            "slab_rows": int(slab.shape[0])}
    return slab, meta


# ------------------------------ wrapper ------------------------------------


def _cost_estimate(meta, batch):
    n, heads, f_out = meta["num_nodes"], meta["heads"], meta["f_out"]
    hf, hn, d = heads * f_out, heads * n, meta["d_model"]
    flops = 0
    for f_in in meta["f_ins"]:
        flops += 2 * n * f_in * hf            # x @ W
        flops += 2 * n * hf * (2 * hn)        # fused score matmul
        flops += 2 * n * hn * hn              # softmax-denominator matmul
        flops += 2 * n * hn * hf              # aggregation matmul
        flops += 10 * n * hn                  # leaky / mask / normalize elementwise
    flops += 2 * hf * d + 10 * d
    trans = len(meta["f_ins"]) * 2 * n * hn   # exp + approx reciprocal
    bytes_accessed = 4 * (batch * (n * meta["f_ins"][0] + n * n + d) + meta["slab_rows"] * LANES)
    return pl.CostEstimate(flops=int(batch * flops), transcendentals=int(batch * trans),
                           bytes_accessed=int(bytes_accessed))


def make_spatial_graph_encoder(meta):
    """Returns encode(x_b [B,N,F0], adj_b [B,N,N], slab) -> [B, d_model]."""
    kernel = _make_encoder_kernel(meta)
    n, d, f0, rows = meta["num_nodes"], meta["d_model"], meta["f_ins"][0], meta["slab_rows"]

    def encode(x_b, adj_b, slab):
        batch = x_b.shape[0]
        out = pl.pallas_call(
            kernel,
            out_shape=jax.ShapeDtypeStruct((batch, 1, d), jnp.float32),
            grid=(batch,),
            in_specs=[
                pl.BlockSpec((None, n, f0), lambda b: (b, 0, 0)),   # per-graph node features
                pl.BlockSpec((None, n, n), lambda b: (b, 0, 0)),    # per-graph 0/1 adjacency (+self loops)
                pl.BlockSpec((rows, LANES), lambda b: (0, 0)),      # parameter slab, VMEM-resident
            ],
            out_specs=pl.BlockSpec((None, 1, d), lambda b: (b, 0, 0)),
            compiler_params=pltpu.CompilerParams(dimension_semantics=("parallel",)),
            cost_estimate=_cost_estimate(meta, batch),
        )(x_b, adj_b, slab)
        return out[:, 0, :]

    return encode


# --------------------------- pure-JAX reference ------------------------------


def _gat_layer_ref(x, w, att_src, att_dst, bias, adj):
    n = x.shape[0]
    h, f_out = att_src.shape
    xp = (x @ w).reshape(n, h, f_out)
    a_src = jnp.einsum("nhf,hf->nh", xp, att_src)
    a_dst = jnp.einsum("nhf,hf->nh", xp, att_dst)
    e = a_dst[:, None, :] + a_src[None, :, :]                    # [i, j, h]
    e = jnp.where(e >= 0, e, 0.2 * e)
    e = jnp.where(adj[:, :, None] > 0, e, NEG_INF)
    alpha = jax.nn.softmax(e, axis=1)
    out = jnp.einsum("ijh,jhf->ihf", alpha, xp).reshape(n, h * f_out) + bias
    return jnp.maximum(out, 0.0)


def _encoder_ref(x, adj, params):
    for layer in params["gat_layers"]:
        x = _gat_layer_ref(x, layer["w"], layer["att_src"], layer["att_dst"], layer["bias"], adj)
    pooled = jnp.mean(x, axis=0, keepdims=True)
    y = pooled @ params["proj_w"] + params["proj_b"]
    mu = jnp.mean(y, axis=-1, keepdims=True)
    var = jnp.mean((y - mu) ** 2, axis=-1, keepdims=True)
    return params["ln_gamma"] * (y - mu) / jnp.sqrt(var + 1e-5) + params["ln_beta"]


# --------------------------------- main --------------------------------------


if __name__ == "__main__":
    # Small config consistent with the module: d_model, gnn_hidden_dim, gnn_heads, gnn_num_layers
    D_MODEL, GNN_HIDDEN, HEADS, NUM_LAYERS = 32, 16, 4, 2
    NUM_NODES, BATCH = 16, 8

    key = jax.random.PRNGKey(0)
    keys = iter(jax.random.split(key, 32))

    # --- deterministic parameter init (shapes from __init__) ---
    gat_layers = []
    in_dim = D_MODEL
    for _ in range(NUM_LAYERS):
        hf = GNN_HIDDEN * HEADS
        scale_w = (2.0 / (in_dim + hf)) ** 0.5
        gat_layers.append({
            "w": scale_w * jax.random.normal(next(keys), (in_dim, hf), jnp.float32),
            "att_src": 0.2 * jax.random.normal(next(keys), (HEADS, GNN_HIDDEN), jnp.float32),
            "att_dst": 0.2 * jax.random.normal(next(keys), (HEADS, GNN_HIDDEN), jnp.float32),
            "bias": jnp.zeros((1, hf), jnp.float32),             # GATConv bias init = zeros
        })
        in_dim = hf

    params = {
        "gat_layers": gat_layers,
        "proj_w": (2.0 / (in_dim + D_MODEL)) ** 0.5
                  * jax.random.normal(next(keys), (in_dim, D_MODEL), jnp.float32),
        "proj_b": 0.05 * jax.random.normal(next(keys), (1, D_MODEL), jnp.float32),
        "ln_gamma": jnp.ones((1, D_MODEL), jnp.float32),         # nn.LayerNorm default init
        "ln_beta": jnp.zeros((1, D_MODEL), jnp.float32),
    }

    # One-time packing at parameter-load time (NOT on the per-call path).
    slab, meta = pack_params(params, NUM_NODES)

    # --- batch of graphs: node features + densified edge_index (adj[target, source]) + self loops ---
    x_b = jax.random.normal(next(keys), (BATCH, NUM_NODES, D_MODEL), jnp.float32)
    adj_b = (jax.random.uniform(next(keys), (BATCH, NUM_NODES, NUM_NODES)) < 0.25).astype(jnp.float32)
    adj_b = jnp.maximum(adj_b, jnp.eye(NUM_NODES, dtype=jnp.float32)[None, :, :])

    encode = jax.jit(make_spatial_graph_encoder(meta))
    out = jax.block_until_ready(encode(x_b, adj_b, slab))         # [B, d_model]

    ref = jax.vmap(lambda xg, ag: _encoder_ref(xg, ag, params)[0])(x_b, adj_b)
    assert out.shape == (BATCH, D_MODEL)
    assert bool(jnp.all(jnp.isfinite(out)))
    assert jnp.allclose(out, ref, rtol=2e-2, atol=2e-2), "mismatch vs. reference"

    print("KERNEL_OK")
</pallas_src>

<mosaic_0001>
module attributes {stable_mosaic.version = 11 : i64} {
  func.func @kernel(%arg0: i32, %arg1: memref<1x16x32xf32, #tpu.memory_space<vmem>>, %arg2: memref<1x16x16xf32, #tpu.memory_space<vmem>>, %arg3: memref<456x128xf32, #tpu.memory_space<vmem>>, %arg4: memref<1x1x32xf32, #tpu.memory_space<vmem>>) attributes {dimension_semantics = [#tpu.dimension_semantics<parallel>], iteration_bounds = array<i64: 8>, scalar_prefetch = 0 : i64, scratch_operands = 0 : i64, tpu.core_type = #tpu.core_type<tc>, window_params = [{transform_indices = @transform_0, window_bounds = array<i64: 1, 16, 32>}, {transform_indices = @transform_1, window_bounds = array<i64: 1, 16, 16>}, {pipeline_mode = #tpu.pipeline_mode<synchronous>, transform_indices = @transform_2, window_bounds = array<i64: 456, 128>}, {transform_indices = @transform_3, window_bounds = array<i64: 1, 1, 32>}]} {
    %c240 = arith.constant 240 : index
    %c0 = arith.constant 0 : index
    %0 = vector.load %arg3[%c240, %c0] : memref<456x128xf32, #tpu.memory_space<vmem>>, vector<64x64xf32>
    %c304 = arith.constant 304 : index
    %c0_0 = arith.constant 0 : index
    %1 = vector.load %arg3[%c304, %c0_0] : memref<456x128xf32, #tpu.memory_space<vmem>>, vector<16x64xf32>
    %c320 = arith.constant 320 : index
    %c0_1 = arith.constant 0 : index
    %2 = vector.load %arg3[%c320, %c0_1] : memref<456x128xf32, #tpu.memory_space<vmem>>, vector<64x64xf32>
    %c0_2 = arith.constant 0 : index
    %c0_3 = arith.constant 0 : index
    %c0_4 = arith.constant 0 : index
    %3 = vector.load %arg2[%c0_2, %c0_3, %c0_4] : memref<1x16x16xf32, #tpu.memory_space<vmem>>, vector<1x16x16xf32>
    %4 = vector.shape_cast %3 : vector<1x16x16xf32> to vector<16x16xf32>
    %cst = arith.constant dense<0.000000e+00> : vector<16x64xf32>
    %5 = tpu.matmul %4, %1, %cst {dimension_numbers = #tpu.dot_dimension_numbers<[1], [0], [0], [1], [0, 0, 1, 1], [], []>} : vector<16x16xf32>, vector<16x64xf32>, vector<16x64xf32> -> vector<16x64xf32>
    %cst_5 = arith.constant 0.000000e+00 : f32
    %6 = vector.broadcast %cst_5 : f32 to vector<16x64xf32>
    %7 = arith.cmpf ogt, %5, %6 : vector<16x64xf32>
    %cst_6 = arith.constant 0.000000e+00 : f32
    %cst_7 = arith.constant -1.000000e+30 : f32
    %8 = vector.broadcast %cst_6 : f32 to vector<16x64xf32>
    %9 = vector.broadcast %cst_7 : f32 to vector<16x64xf32>
    %10 = arith.select %7, %8, %9 : vector<16x64xi1>, vector<16x64xf32>
    %c0_8 = arith.constant 0 : index
    %c0_9 = arith.constant 0 : index
    %c0_10 = arith.constant 0 : index
    %11 = vector.load %arg1[%c0_8, %c0_9, %c0_10] : memref<1x16x32xf32, #tpu.memory_space<vmem>>, vector<1x16x32xf32>
    %12 = vector.shape_cast %11 : vector<1x16x32xf32> to vector<16x32xf32>
    %c0_11 = arith.constant 0 : index
    %c0_12 = arith.constant 0 : index
    %13 = vector.load %arg3[%c0_11, %c0_12] : memref<456x128xf32, #tpu.memory_space<vmem>>, vector<32x64xf32>
    %c32 = arith.constant 32 : index
    %c0_13 = arith.constant 0 : index
    %14 = vector.load %arg3[%c32, %c0_13] : memref<456x128xf32, #tpu.memory_space<vmem>>, vector<64x128xf32>
    %c96 = arith.constant 96 : index
    %c0_14 = arith.constant 0 : index
    %15 = vector.load %arg3[%c96, %c0_14] : memref<456x128xf32, #tpu.memory_space<vmem>>, vector<1x64xf32>
    %cst_15 = arith.constant dense<0.000000e+00> : vector<16x64xf32>
    %16 = tpu.matmul %12, %13, %cst_15 {dimension_numbers = #tpu.dot_dimension_numbers<[1], [0], [0], [1], [0, 0, 1, 1], [], []>} : vector<16x32xf32>, vector<32x64xf32>, vector<16x64xf32> -> vector<16x64xf32>
    %cst_16 = arith.constant dense<0.000000e+00> : vector<16x128xf32>
    %17 = tpu.matmul %16, %14, %cst_16 {dimension_numbers = #tpu.dot_dimension_numbers<[1], [0], [0], [1], [0, 0, 1, 1], [], []>} : vector<16x64xf32>, vector<64x128xf32>, vector<16x128xf32> -> vector<16x128xf32>
    %18 = vector.extract_strided_slice %17 {offsets = [0, 0], sizes = [16, 64], strides = [1, 1]} : vector<16x128xf32> to vector<16x64xf32>
    %19 = vector.extract_strided_slice %17 {offsets = [0, 64], sizes = [16, 64], strides = [1, 1]} : vector<16x128xf32> to vector<16x64xf32>
    %20 = arith.mulf %19, %1 : vector<16x64xf32>
    %cst_17 = arith.constant dense<0.000000e+00> : vector<64xf32>
    %21 = vector.multi_reduction <add>, %20, %cst_17 [0] : vector<16x64xf32> to vector<64xf32>
    %22 = vector.shape_cast %21 : vector<64xf32> to vector<1x64xf32>
    %23 = vector.broadcast %22 : vector<1x64xf32> to vector<16x64xf32>
    %24 = arith.addf %18, %23 : vector<16x64xf32>
    %cst_18 = arith.constant 0.000000e+00 : f32
    %25 = vector.broadcast %cst_18 : f32 to vector<16x64xf32>
    %26 = arith.cmpf oge, %24, %25 : vector<16x64xf32>
    %cst_19 = arith.constant 2.000000e-01 : f32
    %27 = vector.broadcast %cst_19 : f32 to vector<16x64xf32>
    %28 = arith.mulf %27, %24 : vector<16x64xf32>
    %29 = arith.select %26, %24, %28 : vector<16x64xi1>, vector<16x64xf32>
    %30 = arith.addf %29, %10 : vector<16x64xf32>
    %cst_20 = arith.constant dense<0xFF800000> : vector<16xf32>
    %31 = vector.multi_reduction <maximumf>, %30, %cst_20 [1] : vector<16x64xf32> to vector<16xf32>
    %32 = vector.shape_cast %31 : vector<16xf32> to vector<16x1xf32>
    %33 = vector.broadcast %32 : vector<16x1xf32> to vector<16x64xf32>
    %34 = arith.subf %30, %33 : vector<16x64xf32>
    %35 = math.exp %34 : vector<16x64xf32>
    %cst_21 = arith.constant dense<0.000000e+00> : vector<16x64xf32>
    %36 = tpu.matmul %35, %0, %cst_21 {dimension_numbers = #tpu.dot_dimension_numbers<[1], [0], [0], [1], [0, 0, 1, 1], [], []>} : vector<16x64xf32>, vector<64x64xf32>, vector<16x64xf32> -> vector<16x64xf32>
    %37 = tpu.reciprocal %36 {approx = true} : vector<16x64xf32> -> vector<16x64xf32>
    %38 = arith.mulf %35, %37 : vector<16x64xf32>
    %39 = tpu.concatenate %16, %16, %16, %16 in 0 : vector<16x64xf32>, vector<16x64xf32>, vector<16x64xf32>, vector<16x64xf32> -> vector<64x64xf32>
    %40 = arith.mulf %39, %2 : vector<64x64xf32>
    %cst_22 = arith.constant dense<0.000000e+00> : vector<16x64xf32>
    %41 = tpu.matmul %38, %40, %cst_22 {dimension_numbers = #tpu.dot_dimension_numbers<[1], [0], [0], [1], [0, 0, 1, 1], [], []>} : vector<16x64xf32>, vector<64x64xf32>, vector<16x64xf32> -> vector<16x64xf32>
    %42 = vector.broadcast %15 : vector<1x64xf32> to vector<16x64xf32>
    %43 = arith.addf %41, %42 : vector<16x64xf32>
    %cst_23 = arith.constant 0.000000e+00 : f32
    %44 = vector.broadcast %cst_23 : f32 to vector<16x64xf32>
    %45 = arith.maximumf %43, %44 : vector<16x64xf32>
    %c104 = arith.constant 104 : index
    %c0_24 = arith.constant 0 : index
    %46 = vector.load %arg3[%c104, %c0_24] : memref<456x128xf32, #tpu.memory_space<vmem>>, vector<64x64xf32>
    %c168 = arith.constant 168 : index
    %c0_25 = arith.constant 0 : index
    %47 = vector.load %arg3[%c168, %c0_25] : memref<456x128xf32, #tpu.memory_space<vmem>>, vector<64x128xf32>
    %c232 = arith.constant 232 : index
    %c0_26 = arith.constant 0 : index
    %48 = vector.load %arg3[%c232, %c0_26] : memref<456x128xf32, #tpu.memory_space<vmem>>, vector<1x64xf32>
    %cst_27 = arith.constant dense<0.000000e+00> : vector<16x64xf32>
    %49 = tpu.matmul %45, %46, %cst_27 {dimension_numbers = #tpu.dot_dimension_numbers<[1], [0], [0], [1], [0, 0, 1, 1], [], []>} : vector<16x64xf32>, vector<64x64xf32>, vector<16x64xf32> -> vector<16x64xf32>
    %cst_28 = arith.constant dense<0.000000e+00> : vector<16x128xf32>
    %50 = tpu.matmul %49, %47, %cst_28 {dimension_numbers = #tpu.dot_dimension_numbers<[1], [0], [0], [1], [0, 0, 1, 1], [], []>} : vector<16x64xf32>, vector<64x128xf32>, vector<16x128xf32> -> vector<16x128xf32>
    %51 = vector.extract_strided_slice %50 {offsets = [0, 0], sizes = [16, 64], strides = [1, 1]} : vector<16x128xf32> to vector<16x64xf32>
    %52 = vector.extract_strided_slice %50 {offsets = [0, 64], sizes = [16, 64], strides = [1, 1]} : vector<16x128xf32> to vector<16x64xf32>
    %53 = arith.mulf %52, %1 : vector<16x64xf32>
    %cst_29 = arith.constant dense<0.000000e+00> : vector<64xf32>
    %54 = vector.multi_reduction <add>, %53, %cst_29 [0] : vector<16x64xf32> to vector<64xf32>
    %55 = vector.shape_cast %54 : vector<64xf32> to vector<1x64xf32>
    %56 = vector.broadcast %55 : vector<1x64xf32> to vector<16x64xf32>
    %57 = arith.addf %51, %56 : vector<16x64xf32>
    %cst_30 = arith.constant 0.000000e+00 : f32
    %58 = vector.broadcast %cst_30 : f32 to vector<16x64xf32>
    %59 = arith.cmpf oge, %57, %58 : vector<16x64xf32>
    %cst_31 = arith.constant 2.000000e-01 : f32
    %60 = vector.broadcast %cst_31 : f32 to vector<16x64xf32>
    %61 = arith.mulf %60, %57 : vector<16x64xf32>
    %62 = arith.select %59, %57, %61 : vector<16x64xi1>, vector<16x64xf32>
    %63 = arith.addf %62, %10 : vector<16x64xf32>
    %cst_32 = arith.constant dense<0xFF800000> : vector<16xf32>
    %64 = vector.multi_reduction <maximumf>, %63, %cst_32 [1] : vector<16x64xf32> to vector<16xf32>
    %65 = vector.shape_cast %64 : vector<16xf32> to vector<16x1xf32>
    %66 = vector.broadcast %65 : vector<16x1xf32> to vector<16x64xf32>
    %67 = arith.subf %63, %66 : vector<16x64xf32>
    %68 = math.exp %67 : vector<16x64xf32>
    %cst_33 = arith.constant dense<0.000000e+00> : vector<16x64xf32>
    %69 = tpu.matmul %68, %0, %cst_33 {dimension_numbers = #tpu.dot_dimension_numbers<[1], [0], [0], [1], [0, 0, 1, 1], [], []>} : vector<16x64xf32>, vector<64x64xf32>, vector<16x64xf32> -> vector<16x64xf32>
    %70 = tpu.reciprocal %69 {approx = true} : vector<16x64xf32> -> vector<16x64xf32>
    %71 = arith.mulf %68, %70 : vector<16x64xf32>
    %72 = tpu.concatenate %49, %49, %49, %49 in 0 : vector<16x64xf32>, vector<16x64xf32>, vector<16x64xf32>, vector<16x64xf32> -> vector<64x64xf32>
    %73 = arith.mulf %72, %2 : vector<64x64xf32>
    %cst_34 = arith.constant dense<0.000000e+00> : vector<16x64xf32>
    %74 = tpu.matmul %71, %73, %cst_34 {dimension_numbers = #tpu.dot_dimension_numbers<[1], [0], [0], [1], [0, 0, 1, 1], [], []>} : vector<16x64xf32>, vector<64x64xf32>, vector<16x64xf32> -> vector<16x64xf32>
    %75 = vector.broadcast %48 : vector<1x64xf32> to vector<16x64xf32>
    %76 = arith.addf %74, %75 : vector<16x64xf32>
    %cst_35 = arith.constant 0.000000e+00 : f32
    %77 = vector.broadcast %cst_35 : f32 to vector<16x64xf32>
    %78 = arith.maximumf %76, %77 : vector<16x64xf32>
    %cst_36 = arith.constant dense<0.000000e+00> : vector<64xf32>
    %79 = vector.multi_reduction <add>, %78, %cst_36 [0] : vector<16x64xf32> to vector<64xf32>
    %80 = vector.shape_cast %79 : vector<64xf32> to vector<1x64xf32>
    %cst_37 = arith.constant 1.600000e+01 : f32
    %81 = vector.broadcast %cst_37 : f32 to vector<1x64xf32>
    %82 = arith.divf %80, %81 : vector<1x64xf32>
    %c384 = arith.constant 384 : index
    %c0_38 = arith.constant 0 : index
    %83 = vector.load %arg3[%c384, %c0_38] : memref<456x128xf32, #tpu.memory_space<vmem>>, vector<64x32xf32>
    %c448 = arith.constant 448 : index
    %c0_39 = arith.constant 0 : index
    %84 = vector.load %arg3[%c448, %c0_39] : memref<456x128xf32, #tpu.memory_space<vmem>>, vector<3x32xf32>
    %cst_40 = arith.constant dense<0.000000e+00> : vector<1x32xf32>
    %85 = tpu.matmul %82, %83, %cst_40 {dimension_numbers = #tpu.dot_dimension_numbers<[1], [0], [0], [1], [0, 0, 1, 1], [], []>} : vector<1x64xf32>, vector<64x32xf32>, vector<1x32xf32> -> vector<1x32xf32>
    %86 = vector.extract_strided_slice %84 {offsets = [0, 0], sizes = [1, 32], strides = [1, 1]} : vector<3x32xf32> to vector<1x32xf32>
    %87 = arith.addf %85, %86 : vector<1x32xf32>
    %cst_41 = arith.constant dense<0.000000e+00> : vector<1xf32>
    %88 = vector.multi_reduction <add>, %87, %cst_41 [1] : vector<1x32xf32> to vector<1xf32>
    %89 = vector.shape_cast %88 : vector<1xf32> to vector<1x1xf32>
    %cst_42 = arith.constant 3.200000e+01 : f32
    %90 = vector.broadcast %cst_42 : f32 to vector<1x1xf32>
    %91 = arith.divf %89, %90 : vector<1x1xf32>
    %92 = vector.broadcast %91 : vector<1x1xf32> to vector<1x32xf32>
    %93 = arith.subf %87, %92 : vector<1x32xf32>
    %94 = arith.mulf %93, %93 : vector<1x32xf32>
    %cst_43 = arith.constant dense<0.000000e+00> : vector<1xf32>
    %95 = vector.multi_reduction <add>, %94, %cst_43 [1] : vector<1x32xf32> to vector<1xf32>
    %96 = vector.shape_cast %95 : vector<1xf32> to vector<1x1xf32>
    %cst_44 = arith.constant 3.200000e+01 : f32
    %97 = vector.broadcast %cst_44 : f32 to vector<1x1xf32>
    %98 = arith.divf %96, %97 : vector<1x1xf32>
    %99 = vector.extract_strided_slice %84 {offsets = [1, 0], sizes = [1, 32], strides = [1, 1]} : vector<3x32xf32> to vector<1x32xf32>
    %100 = vector.broadcast %91 : vector<1x1xf32> to vector<1x32xf32>
    %101 = arith.subf %87, %100 : vector<1x32xf32>
    %102 = arith.mulf %99, %101 : vector<1x32xf32>
    %cst_45 = arith.constant 9.99999974E-6 : f32
    %103 = vector.broadcast %cst_45 : f32 to vector<1x1xf32>
    %104 = arith.addf %98, %103 : vector<1x1xf32>
    %105 = math.rsqrt %104 : vector<1x1xf32>
    %106 = vector.broadcast %105 : vector<1x1xf32> to vector<1x32xf32>
    %107 = arith.mulf %102, %106 : vector<1x32xf32>
    %108 = vector.extract_strided_slice %84 {offsets = [2, 0], sizes = [1, 32], strides = [1, 1]} : vector<3x32xf32> to vector<1x32xf32>
    %109 = arith.addf %107, %108 : vector<1x32xf32>
    %c0_46 = arith.constant 0 : index
    %c0_47 = arith.constant 0 : index
    %c0_48 = arith.constant 0 : index
    %110 = vector.load %arg4[%c0_46, %c0_47, %c0_48] : memref<1x1x32xf32, #tpu.memory_space<vmem>>, vector<1x1x32xf32>
    %111 = vector.shape_cast %110 : vector<1x1x32xf32> to vector<1x32xf32>
    %112 = vector.shape_cast %109 : vector<1x32xf32> to vector<1x1x32xf32>
    tpu.vector_store %arg4[%c0_46, %c0_47, %c0_48], %112 {strides = array<i32>} : memref<1x1x32xf32, #tpu.memory_space<vmem>>, vector<1x1x32xf32>,
    return
  }
  func.func @transform_0(%arg0: i32) -> (i32, i32, i32) {
    %c0_i32 = arith.constant 0 : i32
    %c0_i32_0 = arith.constant 0 : i32
    %c0_i32_1 = arith.constant 0 : i32
    return %arg0, %c0_i32, %c0_i32_0 : i32, i32, i32
  }
  func.func @transform_1(%arg0: i32) -> (i32, i32, i32) {
    %c0_i32 = arith.constant 0 : i32
    %c0_i32_0 = arith.constant 0 : i32
    %c0_i32_1 = arith.constant 0 : i32
    return %arg0, %c0_i32, %c0_i32_0 : i32, i32, i32
  }
  func.func @transform_2(%arg0: i32) -> (i32, i32) {
    %c0_i32 = arith.constant 0 : i32
    %c0_i32_0 = arith.constant 0 : i32
    %c0_i32_1 = arith.constant 0 : i32
    return %c0_i32, %c0_i32_0 : i32, i32
  }
  func.func @transform_3(%arg0: i32) -> (i32, i32, i32) {
    %c0_i32 = arith.constant 0 : i32
    %c0_i32_0 = arith.constant 0 : i32
    %c0_i32_1 = arith.constant 0 : i32
    return %arg0, %c0_i32, %c0_i32_0 : i32, i32, i32
  }
}

</mosaic_0001>

<bundles_post_ra>
// kernel: encode.1
= control target key start
LH: loop header
LB: loop body
LE: loop exit
PB: predicated region body
PF: predicated region fallthrough
CT: control target
= control target key end

     0   :  { %s2299_s0 = inlined_call_operand.hbm [shape: f32[8,16,32], index: 0, kind: input, shape index: {}]   ;;  %s2300_s1 = inlined_call_operand.hbm [shape: f32[8,16,16], index: 1, kind: input, shape index: {}]   ;;  %s2301_s2 = inlined_call_operand.hbm [shape: f32[456,128], index: 2, kind: input, shape index: {}]   ;;  %s2302_s3 = inlined_call_operand.hbm [shape: f32[8,1,32], index: 3, kind: output, shape index: {}]  }
   0x1   :  { %2310 = sst [smem:[#allocation13_spill]] %s2299_s0 }
   0x2   :  { %2311 = sst [smem:[#allocation14_spill]] %s2301_s2 }
   0x3   :  { %8 = vsyncpa [#allocation3], 0 }
   0x4   :  { %10 = vsyncpa [#allocation3 + $0x1], 0 }
   0x5   :  { %11 = vsyncpa [#allocation6], 0 }
   0x6   :  { %13 = vsyncpa [#allocation6 + $0x1], 0 }
   0x7   :  { %14 = vsyncpa [#allocation4], 0 }
   0x8   :  { %16 = vsyncpa [#allocation4 + $0x1], 0  ;;  %s1952_s12 = smov 0   ;;  %s1954_s13 = smov 0  }
   0x9   :  { %s1956_s14 = smov 0   ;;  %s1958_s15 = smov 0  }
   0xa LB: > { %s1973_s16 = sadd.s32 4294967295, %s1920_s15   ;;  %s1381_s17 = sadd.s32 4294967294, %s1920_s15   ;;  %s1920_s15 = sphi %s1958_s15, %s2331_s15   ;;  %s1916_s14 = sphi %s1956_s14, %s2330_s14   ;;  %s1912_s13 = sphi %s1954_s13, %s2329_s13   ;;  %s1908_s12 = sphi %s1952_s12, %s2328_s12  }
   0xb   : > { %p42_p0 = scmp.ne.s32.totalorder %s1912_s13, %s1908_s12  ;;  %p2307_p1 = scmp.eq.s32.totalorder %s1973_s16, 0 }
   0xc   : > { %p119_p3 = scmp.eq.s32.totalorder %s1381_s17, 7  ;;  %p1382_p5 = scmp.ge.s32.totalorder %s1920_s15, 1 }
   0xd   : > { %p1982_p4 = por %p2307_p1, %p42_p0  ;;  %p126_p7 = scmp.lt.s32.totalorder %s1920_s15, 9 }
   0xe   : > { %p1987_p6 = por %p119_p3, %p42_p0  ;;  %s1922_s21 = smov [#allocation7]  }
   0xf   : > { %s2312_s18 = scalar_select %p1982_p4, 1, 0 }
  0x10   : > { %s2313_s19 = scalar_select %p1987_p6, 1, 0 }
  0x11   : > { %p1992_p8 = pnand %p1382_p5, %p126_p7  ;;  %s138_s22 = sshll.u32 %s1922_s21, 4  ;;  %s139_s22 = int_to_ptr.vmem [resolvable:$true] %s138_s22 }
  0x12   : > { %s2005_s24 = sadd.s32 1, %s1920_s15   ;;  %s29_s25 = sadd.s32 1, %s1916_s14 }
  0x13   : > { %p1690_p9 = pneg %p1992_p8  ;;  %s26_s26 = ssub.s32 %s1920_s15, %s2005_s24 }
  0x14   : > { %s1777_s27 = scalar_lea.vmem %s139_s22, 7296  ;;  %p1785_p3 = scmp.lt.s32.totalorder %s139_s22, %s139_s22 }
  0x15   : > { %p2000_p10 = pnand %p1690_p9, %p2307_p1  ;;  %p1778_p12 = scmp.ne.s32.totalorder %s139_s22, %s1777_s27 }
  0x16   : > { %p1786_p5 = scmp.lt.s32.totalorder %s1777_s27, %s1777_s27 }
  0x17   : > { %p1768_p11 = pneg %p2000_p10 }
  0x18   : > { %p1787_p7 = por %p1786_p5, %p1785_p3 }
  0x19   : > { %p1780_p13 = pnand %p1778_p12, %p1768_p11 }
  0x1b   : > { %p1781_p0 = pneg %p1780_p13 }
  0x1d   : > { %p1788_p2 = pnand %p1787_p7, %p1781_p0 }
  0x1f   : > { %1791 = shalt.err (!%p1788_p2)
}
  0x20   : > { %s2303_s28 = smov 128   ;;  %s2305_s29 = smov 8  }
  0x21   : > { %s2316_s2 = sld [smem:[#allocation14_spill]]  ;;  %p27_p2 = scmp.eq.s32.totalorder %s26_s26, 0 }
  0x22   : > { %p36_p9 = scmp.ne.s32.totalorder %s1916_s14, %s1912_s13  ;;  %p37_p11 = scmp.eq.s32.totalorder %s1920_s15, 0 }
  0x23   : > { %p1706_p12 = scmp.lt.s32.totalorder %s1920_s15, 8  ;;  %p2317_p0 = scmp.eq.s32.totalorder %s1973_s16, 7 }
  0x24   : > { %s2025_s5 = scalar_select %p27_p2, %s1916_s14, %s29_s25  }
  0x25   : > { %p38_p13 = por %p37_p11, %p36_p9  ;;  %p2029_p3 = por %p2317_p0, %p36_p9 }
  0x26   : > { %s152_s7 = sand.u32 1, %s1916_s14   ;;  %s1419_s8 = sshll.u32 %s1920_s15, 8 }
  0x27   : > { %1693 = dma.hbm_to_vmem [thread:$0]  (!%p2000_p10), %s2316_s2, 7296, %s139_s22, [#allocation6], %s2303_s28, %s2303_s28, %s2305_s29  }
  0x28   : > { %s2318_s6 = scalar_select %p2029_p3, 1, 0 }
  0x29   : > { %s2035_s9 = sshll.u32 %s152_s7, 4  ;;  %s2319_s0 = sld [smem:[#allocation13_spill]] }
  0x2a   : > { %s156_s21 = scalar_lea.vmem [#allocation2], %s2035_s9  ;;  %p2043_p10 = pnand %p1706_p12, %p38_p13 }
  0x2b   : > { %s163_s22 = sshll.u32 %s156_s21, 4  ;;  %s2052_s27 = scalar_lea.hbm %s2300_s1, %s1419_s8  ;;  %s2047_s22 = int_to_ptr.vmem [resolvable:$true] %s163_s22 }
  0x2c   : > { %s2054_s30 = scalar_lea.sflag [#allocation3], %s152_s7  ;;  %p1794_p7 = pneg %p2043_p10 }
  0x2f   : > { %s2040_s17 = scalar_lea.hbm %s2319_s0, %s1419_s8  ;;  %s1797_s21 = scalar_lea.hbm %s2319_s0, 2048 }
  0x30   : > { %s1792_s4 = scalar_lea.hbm %s2040_s17, 256  ;;  %p1798_p11 = scmp.lt.s32.totalorder %s2040_s17, %s2319_s0 }
  0x31   : > { %p1793_p5 = scmp.ne.s32.totalorder %s2040_s17, %s1792_s4  ;;  %p1799_p12 = scmp.lt.s32.totalorder %s1797_s21, %s1792_s4 }
  0x33   : > { %p1795_p2 = pnand %p1794_p7, %p1793_p5  ;;  %p1800_p13 = por %p1799_p12, %p1798_p11 }
  0x35   : > { %p1796_p9 = pneg %p1795_p2 }
  0x37   : > { %p1801_p0 = pnand %p1800_p13, %p1796_p9 }
  0x39   : > { %1804 = shalt.err (!%p1801_p0)
}
  0x3a   : > { %s1805_s7 = scalar_lea.vmem %s2047_s22, 256  ;;  %s1925_s8 = smov [#allocation2]  }
  0x3b   : > { %p1806_p1 = scmp.ne.s32.totalorder %s2047_s22, %s1805_s7  ;;  %s1810_s25 = sshll.u32 %s1925_s8, 4  ;;  %s1811_s25 = int_to_ptr.vmem [resolvable:$false] %s1810_s25 }
  0x3c   : > { %s1812_s26 = scalar_lea.vmem %s1811_s25, 512  ;;  %p1813_p6 = scmp.lt.s32.totalorder %s2047_s22, %s1811_s25 }
  0x3d   : > { %p1808_p5 = pnand %p1806_p1, %p1794_p7  ;;  %p1814_p3 = scmp.lt.s32.totalorder %s1812_s26, %s1805_s7 }
  0x3f   : > { %p1809_p2 = pneg %p1808_p5  ;;  %p1815_p4 = por %p1814_p3, %p1813_p6 }
  0x41   : > { %p1816_p11 = pnand %p1815_p4, %p1809_p2 }
  0x43   : > { %1819 = shalt.err (!%p1816_p11)
}
  0x44   : > { %s2321_s28 = smov 8   ;;  %s2322_s29 = smov 128  }
  0x45   : > { %1697 = dma.hbm_to_vmem [thread:$0]  (!%p2043_p10), %s2040_s17, 256, %s2047_s22, %s2054_s30, %s2322_s29, %s2322_s29, %s2321_s28  }
  0x46   : > { %s177_s4 = scalar_lea.vmem [#allocation5], %s2035_s9  ;;  %s173_s11 = sand.u32 1, %s1920_s15  }
  0x47   : > { %s184_s10 = sshll.u32 %s177_s4, 4  ;;  %s174_s21 = scalar_lea.sflag [#allocation6], %s173_s11  ;;  %s2086_s10 = int_to_ptr.vmem [resolvable:$true] %s184_s10 }
  0x48   : > { %s1820_s7 = scalar_lea.hbm %s2052_s27, 256  ;;  %s1825_s26 = scalar_lea.hbm %s2300_s1, 2048 }
  0x49   : > { %p1821_p1 = scmp.ne.s32.totalorder %s2052_s27, %s1820_s7  ;;  %p1826_p3 = scmp.lt.s32.totalorder %s2052_s27, %s2300_s1 }
  0x4a   : > { %p1827_p9 = scmp.lt.s32.totalorder %s1825_s26, %s1820_s7 }
  0x4b   : > { %p1823_p4 = pnand %p1821_p1, %p1794_p7 }
  0x4c   : > { %p1828_p12 = por %p1827_p9, %p1826_p3 }
  0x4d   : > { %p1824_p6 = pneg %p1823_p4 }
  0x4f   : > { %p1829_p13 = pnand %p1828_p12, %p1824_p6 }
  0x51   : > { %1832 = shalt.err (!%p1829_p13)
}
  0x52   : > { %s1833_s9 = scalar_lea.vmem %s2086_s10, 256  ;;  %s1926_s17 = smov [#allocation5]  }
  0x53   : > { %p1834_p0 = scmp.ne.s32.totalorder %s2086_s10, %s1833_s9  ;;  %s1838_s22 = sshll.u32 %s1926_s17, 4  ;;  %s1839_s22 = int_to_ptr.vmem [resolvable:$false] %s1838_s22 }
  0x54   : > { %s1840_s30 = scalar_lea.vmem %s1839_s22, 512  ;;  %p1841_p11 = scmp.lt.s32.totalorder %s2086_s10, %s1839_s22 }
  0x55   : > { %p1836_p5 = pnand %p1834_p0, %p1794_p7  ;;  %p1842_p1 = scmp.lt.s32.totalorder %s1840_s30, %s1833_s9 }
  0x57   : > { %p1837_p2 = pneg %p1836_p5  ;;  %p1843_p4 = por %p1842_p1, %p1841_p11 }
  0x59   : > { %p1844_p3 = pnand %p1843_p4, %p1837_p2 }
  0x5b   : > { %1847 = shalt.err (!%p1844_p3)
}
  0x5c   : > { %1700 = dma.hbm_to_vmem [thread:$0]  (!%p2043_p10), %s2052_s27, 256, %s2086_s10, %s174_s21, %s2322_s29, %s2322_s29, %s2321_s28  }
  0x5d   : > { %196 = sbr.rel (%p1992_p8) target bundleno = 2850 (0xb22), region = 32  ;;  %s2116_s0 = sand.u32 (!%p1992_p8), 1, %s1912_s13  }
  0x5e   : > { %s1392_s2 = sshll.u32 (!%p1992_p8), %s2116_s0, 4  ;;  %s199_s4 = scalar_lea.sflag (!%p1992_p8), [#allocation3], %s2116_s0 }
  0x5f   : > { %s2120_s11 = scalar_lea.vmem (!%p1992_p8), [#allocation2], %s1392_s2  ;;  %p2323_p7 = scmp.ne.s32.totalorder (!%p1992_p8), %s2312_s18, 0 }
  0x62   : > { %1891 = dma.done.wait (%p2323_p7), %s199_s4, 256  }
  0x63   : > { %1893 = vsyncadd (%p2323_p7), %s199_s4, 4294967040  ;;  %s207_s23 = sand.u32 1, %s1973_s16   ;;  %s211_s27 = scalar_lea.vmem [#allocation5], %s1392_s2 }
  0x64   : > { %s208_s20 = scalar_lea.sflag [#allocation6], %s207_s23 }
  0x65   : > { %1895 = dma.done.wait (%p2323_p7), %s208_s20, 256  }
  0x66   : > { %1897 = vsyncadd (%p2323_p7), %s208_s20, 4294967040  ;;  %p2324_p8 = scmp.eq.s32.totalorder %s1973_s16, 0 }
  0x68   : > { %1899 = dma.done.wait (%p2324_p8), [#allocation6], 7296   ;;  %p2325_p10 = pmov %p2324_p8 }
  0x69   : > { %vm363_vm0 = vcmask 261120   ;;  %v353_v0 = vld [vmem:[#allocation7 + $0x18] sm:$0xff]  ;;  %v352_v1 = vld [vmem:[#allocation7 + $0x10] sm:$0xff]  ;;  %v351_v3 = vld [vmem:[#allocation7 + $0x8] sm:$0xff]  ;;  %vm262_vm1 = vcmask 130048   ;;  %s1927_s18 = smov 64  }
  0x6a   : > { %1901 = vsyncadd (%p2325_p10), [#allocation6], 4294960000  ;;  %1517 = vmatprep.subr.mxu1 %v353_v0  ;;  %v348_v2 = vld [vmem:[%s2120_s11] sm:$0xff]  ;;  %v251_v4 = vld [vmem:[#allocation7 + $0x138] sm:$0xff]  ;;  %vm445_vm2 = vcmask 523264   ;;  %vm537_vm3 = vcmask 1048064  }
  0x6b   : > { %1518 = vmatpush3.msra.mxu1 %v353_v0  ;;  %1525 = vmatprep.mubr.msk.f32.mxu1 %vm363_vm0, %v348_v2  ;;  %v250_v5 = vld [vmem:[#allocation7 + $0x130] sm:$0xff]  ;;  %v350_v6 = vld [vmem:[#allocation7] sm:$0xff]  ;;  %v261_v8 = vld [vmem:[%s211_s27 + $0x8] sm:$0xff]  ;;  %v1928_v58 = vmov -1e+30   ;;  %vm1930_vm10 = vmmov 0  }
  0x6c   : > { %1519 = vmatprep.subr.mxu1 %v352_v1  ;;  %1510 = vmatprep.subr.mxu0 %v251_v4  ;;  %v260_v7 = vld [vmem:[%s211_s27] sm:$0xff]  ;;  %v349_v9 = vld [vmem:[%s2120_s11 + $0x8] sm:$0xff]  ;;  %vm1242_vm11 = vcmask 253952   ;;  %s1416_s28 = sshll.u32 %s1973_s16, 4  ;;  %s241_s29 = scalar_lea.vmem [#allocation8], %s2116_s0  ;;  %vm1268_vm12 = vcmask 254977  }
  0x6d   : > { %1520 = vmatpush3.msra.mxu1 %v352_v1  ;;  %1511 = vmatpush3.msra.mxu0 %v251_v4  ;;  %v361_v10 = vld [vmem:[#allocation7 + $0x58] sm:$0xff]  ;;  %v360_v11 = vld [vmem:[#allocation7 + $0x50] sm:$0xff]  ;;  %v359_v12 = vld [vmem:[#allocation7 + $0x48] sm:$0xff]  ;;  %s1283_s10 = sshll.u32 %s241_s29, 4  ;;  %s1281_s8 = scalar_lea.hbm %s2302_s3, %s1416_s28  ;;  %s1284_s10 = int_to_ptr.vmem [resolvable:$true] %s1283_s10 }
  0x6e   : > { %1521 = vmatprep.subr.mxu1 %v351_v3  ;;  %1512 = vmatprep.subr.mxu0 %v250_v5  ;;  %v358_v13 = vld [vmem:[#allocation7 + $0x40] sm:$0xff]  ;;  %v357_v14 = vld [vmem:[#allocation7 + $0x38] sm:$0xff]  ;;  %v356_v15 = vld [vmem:[#allocation7 + $0x30] sm:$0xff]  ;;  %s1271_s25 = scalar_lea.sflag [#allocation4], %s2116_s0  ;;  %s1848_s26 = scalar_lea.vmem %s1284_s10, 16 }
  0x6f   : > { %1522 = vmatpush3.msra.mxu1 %v351_v3  ;;  %1513 = vmatpush3.msra.mxu0 %v250_v5  ;;  %v355_v16 = vld [vmem:[#allocation7 + $0x28] sm:$0xff]  ;;  %v354_v17 = vld [vmem:[#allocation7 + $0x20] sm:$0xff]  ;;  %v2141_v18 = vld [vmem:[#allocation7 + $0x178] sm:$0xff]  ;;  %p1849_p6 = scmp.ne.s32.totalorder %s1284_s10, %s1848_s26  ;;  %p2326_p9 = scmp.ne.s32.totalorder %s2318_s6, 0 }
  0x70   : > { %1523 = vmatprep.subr.mxu1 %v350_v6  ;;  %1514 = vmatprep.mubr.msk.f32.mxu0 %vm262_vm1, %v260_v7  ;;  %v2143_v20 = vld [vmem:[#allocation7 + $0x170] sm:$0xff]  ;;  %v2148_v24 = vld [vmem:[#allocation7 + $0x168] sm:$0xff]  ;;  %v2151_v25 = vld [vmem:[#allocation7 + $0x160] sm:$0xff]  ;;  %s1931_s9 = smov [#allocation8]  }
  0x71   : > { %1524 = vmatpush3.msra.mxu1 %v350_v6  ;;  %1515 = vmatmul.mubr.msk.f32.vlgmr.msra.gmra.mxu0 %vm262_vm1, %v261_v8  ;;  %v2154_v27 = vld [vmem:[#allocation7 + $0x158] sm:$0xff]  ;;  %v2157_v29 = vld [vmem:[#allocation7 + $0x150] sm:$0xff]  ;;  %v2160_v31 = vld [vmem:[#allocation7 + $0x148] sm:$0xff]  ;;  %p1850_p12 = pnand %p1849_p6, %p2326_p9  ;;  %s1852_s17 = sshll.u32 %s1931_s9, 4  ;;  %s1853_s17 = int_to_ptr.vmem [resolvable:$false] %s1852_s17 }
  0x72   : > { %1526 = vmatmul.mubr.msk.f32.vlgmr.msra.gmra.mxu1 %vm363_vm0, %v349_v9  ;;  %1528 = vmatprep.subr.mxu0 %v361_v10  ;;  %v2163_v33 = vld [vmem:[#allocation7 + $0x140] sm:$0xff]  ;;  %v2184_v3 = vld [vmem:[#allocation7 + $0x128] sm:$0xff]  ;;  %v2194_v6 = vld [vmem:[#allocation7 + $0x110] sm:$0xff]  ;;  %s1854_s16 = scalar_lea.vmem %s1853_s17, 32  ;;  %p1855_p0 = scmp.lt.s32.totalorder %s1284_s10, %s1853_s17 }
  0x73   : > { %1529 = vmatpush3.msra.mxu0 %v361_v10  ;;  %529 = vrot.lane.b32.xlu0 %v250_v5, %s1927_s18  ;;  %v2190_v5 = vld [vmem:[#allocation7 + $0x118] sm:$0xff]  ;;  %v2198_v7 = vld [vmem:[#allocation7 + $0x108] sm:$0xff]  ;;  %v2202_v8 = vld [vmem:[#allocation7 + $0x100] sm:$0xff]  ;;  %p1851_p13 = pneg %p1850_p12  ;;  %p1856_p5 = scmp.lt.s32.totalorder %s1854_s16, %s1848_s26 }
  0x74   : > { %1530 = vmatprep.subr.mxu0 %v360_v11  ;;  %1547 = vmatprep.subr.mxu1 %v2184_v3  ;;  %v2206_v9 = vld [vmem:[#allocation7 + $0xf8] sm:$0xff]  ;;  %v2210_v10 = vld [vmem:[#allocation7 + $0xf0] sm:$0xff] }
  0x75   : > { %1531 = vmatpush3.msra.mxu0 %v360_v11  ;;  %1548 = vmatpush3.msra.mxu1 %v2184_v3  ;;  %p1857_p2 = por %p1856_p5, %p1855_p0 }
  0x76   : > { %1532 = vmatprep.subr.mxu0 %v359_v12 }
  0x77   : > { %1533 = vmatpush3.msra.mxu0 %v359_v12  ;;  %531 = vrot.lane.b32.xlu0 %v251_v4, %s1927_s18  ;;  %v2188_v4 = vld [vmem:[#allocation7 + $0x120] sm:$0xff]  ;;  %p1858_p11 = pnand %p1857_p2, %p1851_p13 }
  0x78   : > { %1534 = vmatprep.subr.mxu0 %v358_v13  ;;  %1549 = vmatprep.subr.mxu1 %v2188_v4 }
  0x79   : > { %1535 = vmatpush3.msra.mxu0 %v358_v13  ;;  %1550 = vmatpush3.msra.mxu1 %v2188_v4 }
  0x7a   : > { %1536 = vmatprep.subr.mxu0 %v357_v14  ;;  %1551 = vmatprep.subr.mxu1 %v2190_v5 }
  0x7b   : > { %1537 = vmatpush3.msra.mxu0 %v357_v14  ;;  %1552 = vmatpush3.msra.mxu1 %v2190_v5 }
  0x7c   : > { %1538 = vmatprep.subr.mxu0 %v356_v15  ;;  %1553 = vmatprep.subr.mxu1 %v2194_v6 }
  0x7d   : > { %1539 = vmatpush3.msra.mxu0 %v356_v15  ;;  %1554 = vmatpush3.msra.mxu1 %v2194_v6 }
  0x7e   : > { %1540 = vmatprep.subr.mxu0 %v355_v16  ;;  %1555 = vmatprep.subr.mxu1 %v2198_v7 }
  0x7f   : > { %1541 = vmatpush3.msra.mxu0 %v355_v16  ;;  %1556 = vmatpush3.msra.mxu1 %v2198_v7 }
  0x80   : > { %1542 = vmatprep.subr.mxu0 %v354_v17  ;;  %1557 = vmatprep.subr.mxu1 %v2202_v8 }
  0x81   : > { %1543 = vmatpush3.msra.mxu0 %v354_v17  ;;  %1558 = vmatpush3.msra.mxu1 %v2202_v8 }
  0x82   : > { %1559 = vmatprep.subr.mxu1 %v2206_v9 }
  0x83   : > { %1560 = vmatpush3.msra.mxu1 %v2206_v9 }
  0x84   : > { %1561 = vmatprep.subr.mxu1 %v2210_v10 }
  0x85   : > { %1562 = vmatpush3.msra.mxu1 %v2210_v10 }
  0xe5   : > { %v2167_v36 = vpop.permute.xlu0 %529 }
  0xe9   : > { %v2169_v39 = vpop.permute.xlu0 %531 }
 0x131   : > { %v1516_v37 = vpop.f32.mrf.mxu0 }
 0x132   : > { %v1527_v19 = vpop.f32.mrf.mxu1  ;;  %vm345_vm4 = vcmp.gt.f32.partialorder %v1516_v37, 0.0 }
 0x133   : > { %v665_v21 = vmul.f32 %v1527_v19, %v2141_v18  ;;  %v663_v26 = vmul.f32 %v1527_v19, %v2148_v24  ;;  %v661_v30 = vmul.f32 %v1527_v19, %v2154_v27  ;;  %v659_v34 = vmul.f32 %v1527_v19, %v2160_v31  ;;  %v335_v38 = vpop.f32.mrf.mxu0 }
 0x134   : > { %v436_v22 = vpop.f32.mrf.mxu1  ;;  %vm344_vm5 = vcmp.gt.f32.partialorder %v335_v38, 0.0  ;;  %v2176_v59 = vsel %vm345_vm4, 0.0, %v1928_v58  ;;  %v756_v38 = vld [vmem:[#allocation7 + $0x80] sm:$0xff] }
 0x135   : > { %1544 = vmatprep.mubr.msk.f32.mxu0 %vm445_vm2, %v436_v22  ;;  %1566 = vmatprep.subr.mxu0 %v665_v21  ;;  %v664_v23 = vmul.f32 %v436_v22, %v2143_v20  ;;  %v662_v28 = vmul.f32 %v436_v22, %v2151_v25  ;;  %v660_v32 = vmul.f32 %v436_v22, %v2157_v29  ;;  %v2178_v60 = vsel %vm344_vm5, 0.0, %v1928_v58 }
 0x136   : > { %1545 = vmatmul.mubr.msk.f32.vlgmr.msra.gmra.mxu0 %vm445_vm2, %v1527_v19  ;;  %v658_v35 = vmul.f32 %v436_v22, %v2163_v33  ;;  %v759_v22 = vld [vmem:[#allocation7 + $0x98] sm:$0xff] }
 0x137   : > { %1567 = vmatpush3.msra.mxu0 %v665_v21  ;;  %v760_v21 = vld [vmem:[#allocation7 + $0xa0] sm:$0xff] }
 0x138   : > { %1568 = vmatprep.subr.mxu0 %v664_v23  ;;  %1585 = vmatprep.subr.mxu1 %v760_v21 }
 0x139   : > { %1569 = vmatpush3.msra.mxu0 %v664_v23  ;;  %v758_v23 = vld [vmem:[#allocation7 + $0x90] sm:$0xff] }
 0x13a   : > { %1570 = vmatprep.subr.mxu0 %v663_v26 }
 0x13b   : > { %1571 = vmatpush3.msra.mxu0 %v663_v26  ;;  %v757_v26 = vld [vmem:[#allocation7 + $0x88] sm:$0xff] }
 0x13c   : > { %1572 = vmatprep.subr.mxu0 %v662_v28 }
 0x13d   : > { %1573 = vmatpush3.msra.mxu0 %v662_v28 }
 0x13e   : > { %1574 = vmatprep.subr.mxu0 %v661_v30 }
 0x13f   : > { %1575 = vmatpush3.msra.mxu0 %v661_v30 }
 0x140   : > { %1576 = vmatprep.subr.mxu0 %v660_v32 }
 0x141   : > { %1577 = vmatpush3.msra.mxu0 %v660_v32 }
 0x142   : > { %1578 = vmatprep.subr.mxu0 %v659_v34 }
 0x143   : > { %1579 = vmatpush3.msra.mxu0 %v659_v34 }
 0x144   : > { %1580 = vmatprep.subr.mxu0 %v658_v35 }
 0x145   : > { %1581 = vmatpush3.msra.mxu0 %v658_v35 }
 0x1f6   : > { %v1546_v40 = vpop.f32.mrf.mxu0 }
 0x1f7   : > { %v536_v41 = vmul.f32 %v1546_v40, %v2169_v39 }
 0x1f8   : > { %v518_v42 = vpop.f32.mrf.mxu0 }
 0x1f9   : > { %v535_v43 = vmul.f32 %v2167_v36, %v518_v42  ;;  %v539_v44 = vsel %vm537_vm3, %v536_v41, 0.0  ;;  %v754_v41 = vld [vmem:[#allocation7 + $0x70] sm:$0xff] }
 0x1fb   : > { %v538_v45 = vsel %vm537_vm3, %v535_v43, 0.0  ;;  %v768_v43 = vld [vmem:[#allocation7 + $0xe0] sm:$0xff] }
 0x1fc   : > { %v540_v46 = vadd.f32 %v539_v44, %v538_v45  ;;  %v767_v44 = vld [vmem:[#allocation7 + $0xd8] sm:$0xff]  ;;  %1604 = vmatprep.subr.mxu0 %v768_v43  ;;  %v766_v45 = vld [vmem:[#allocation7 + $0xd0] sm:$0xff] }
 0x1fe   : > { %v541_v47 = vrot.slane %v540_v46, 4 }
 0x200   : > { %v542_v48 = vadd.f32 %v541_v47, %v540_v46  ;;  %v765_v46 = vld [vmem:[#allocation7 + $0xc8] sm:$0xff]  ;;  %v764_v47 = vld [vmem:[#allocation7 + $0xc0] sm:$0xff] }
 0x202   : > { %v543_v49 = vrot.slane %v542_v48, 2 }
 0x204   : > { %v544_v50 = vadd.f32 %v543_v49, %v542_v48  ;;  %v763_v48 = vld [vmem:[#allocation7 + $0xb8] sm:$0xff]  ;;  %v762_v49 = vld [vmem:[#allocation7 + $0xb0] sm:$0xff] }
 0x206   : > { %v545_v51 = vrot.slane %v544_v50, 1 }
 0x208   : > { %v546_v52 = vadd.f32 %v545_v51, %v544_v50  ;;  %v1403_v50 = vld [vmem:[#allocation7 + $0x60] ss:$0 sm:$0xff] }
 0x20a   : > { %548 = vrot.lane.b32.xlu1 %v546_v52, %s1927_s18 }
 0x27c   : > { %v549_v53 = vpop.permute.xlu1 %548 }
 0x27d   : > { %v551_v54 = vadd.f32 %v549_v53, %v518_v42  ;;  %v552_v55 = vadd.f32 %v1546_v40, %v549_v53  ;;  %v755_v40 = vld [vmem:[#allocation7 + $0x78] sm:$0xff]  ;;  %v753_v42 = vld [vmem:[#allocation7 + $0x68] sm:$0xff] }
 0x27f   : > { %v555_v56 = vmul.f32 0.2, %v551_v54  ;;  %v556_v57 = vmul.f32 0.2, %v552_v55  ;;  %vm554_vm6 = vcmp.ge.f32.partialorder %v552_v55, 0.0  ;;  %vm553_vm7 = vcmp.ge.f32.partialorder %v551_v54, 0.0 }
 0x281   : > { %v558_v61 = vsel %vm554_vm6, %v552_v55, %v556_v57  ;;  %v557_v62 = vsel %vm553_vm7, %v551_v54, %v555_v56  ;;  %v761_v57 = vld [vmem:[#allocation7 + $0xa8] sm:$0xff] }
 0x282   : > { %v560_v63 = vadd.f32 %v558_v61, %v2176_v59  ;;  %v559_v0 = vadd.f32 %v557_v62, %v2178_v60 }
 0x284   : > { %v564_v1 = vsel %vm445_vm2, %v560_v63, -inf  ;;  %v561_v2 = vsel %vm445_vm2, %v559_v0, -inf }
 0x285   : > { %565 = vmax.xlane.f32.xlu0 %v564_v1  ;;  %562 = vmax.xlane.f32.xlu1 %v561_v2 }
 0x30e   : > { %v566_v11 = vpop.xlane.xlu0 %565  ;;  %v563_v12 = vpop.xlane.xlu1 %562 }
 0x30f   : > { %v568_v13 = vsub.f32 %v560_v63, %v566_v11  ;;  %v567_v14 = vsub.f32 %v559_v0, %v563_v12 }
 0x311   : > { %v571_v15 = vmul.f32 1.442695, %v568_v13  ;;  %v569_v16 = vmul.f32 1.442695, %v567_v14 }
 0x313   : > { %1748 = vpow2.f32 %v571_v15 }
 0x314   : > { %1750 = vpow2.f32 %v569_v16 }
 0x320   : > { %v1749_v17 = vpop.eup %1748 }
 0x321   : > { %v1751_v19 = vpop.eup %1750 }
 0x322   : > { %1563 = vmatprep.mubr.msk.f32.mxu1 %vm445_vm2, %v1751_v19 }
 0x323   : > { %1564 = vmatmul.mubr.msk.f32.vlgmr.msra.gmra.mxu1 %vm445_vm2, %v1749_v17 }
 0x324   : > { %1586 = vmatpush3.msra.mxu1 %v760_v21 }
 0x325   : > { %1587 = vmatprep.subr.mxu1 %v759_v22 }
 0x326   : > { %1588 = vmatpush3.msra.mxu1 %v759_v22 }
 0x327   : > { %1589 = vmatprep.subr.mxu1 %v758_v23 }
 0x328   : > { %1590 = vmatpush3.msra.mxu1 %v758_v23 }
 0x329   : > { %1591 = vmatprep.subr.mxu1 %v757_v26 }
 0x32a   : > { %1592 = vmatpush3.msra.mxu1 %v757_v26 }
 0x32b   : > { %1593 = vmatprep.subr.mxu1 %v756_v38 }
 0x32c   : > { %1594 = vmatpush3.msra.mxu1 %v756_v38 }
 0x32d   : > { %1595 = vmatprep.subr.mxu1 %v755_v40 }
 0x32e   : > { %1596 = vmatpush3.msra.mxu1 %v755_v40 }
 0x32f   : > { %1597 = vmatprep.subr.mxu1 %v754_v41 }
 0x330   : > { %1598 = vmatpush3.msra.mxu1 %v754_v41 }
 0x331   : > { %1599 = vmatprep.subr.mxu1 %v753_v42 }
 0x332   : > { %1600 = vmatpush3.msra.mxu1 %v753_v42  ;;  %v1929_v42 = vmov 0.0  }
 0x333   : > { %1623 = vmatprep.subr.mxu1 %v2184_v3 }
 0x3e3   : > { %v1565_v28 = vpop.f32.mrf.mxu1 }
 0x3e4   : > { %1752 = vrcp.f32 %v1565_v28 }
 0x3e5   : > { %v645_v30 = vpop.f32.mrf.mxu1 }
 0x3e6   : > { %1754 = vrcp.f32 %v645_v30 }
 0x3f1   : > { %v1753_v32 = vpop.eup %1752 }
 0x3f2   : > { %v657_v37 = vmul.f32 %v1753_v32, %v1749_v17 }
 0x3f3   : > { %v1755_v34 = vpop.eup %1754 }
 0x3f4   : > { %v656_v35 = vmul.f32 %v1755_v34, %v1751_v19 }
 0x3f6   : > { %1582 = vmatprep.mubr.msk.f32.mxu0 %vm445_vm2, %v656_v35 }
 0x3f7   : > { %1583 = vmatmul.mubr.msk.f32.vlgmr.msra.gmra.mxu0 %vm445_vm2, %v657_v37 }
 0x3f8   : > { %1605 = vmatpush3.msra.mxu0 %v768_v43  ;;  %v1167_v43 = vld [vmem:[#allocation7 + $0x1b8] sm:$0xff] }
 0x3f9   : > { %1606 = vmatprep.subr.mxu0 %v767_v44 }
 0x3fa   : > { %1607 = vmatpush3.msra.mxu0 %v767_v44  ;;  %v1166_v44 = vld [vmem:[#allocation7 + $0x1b0] sm:$0xff] }
 0x3fb   : > { %1608 = vmatprep.subr.mxu0 %v766_v45 }
 0x3fc   : > { %1609 = vmatpush3.msra.mxu0 %v766_v45  ;;  %v1165_v45 = vld [vmem:[#allocation7 + $0x1a8] sm:$0xff] }
 0x3fd   : > { %1610 = vmatprep.subr.mxu0 %v765_v46 }
 0x3fe   : > { %1611 = vmatpush3.msra.mxu0 %v765_v46  ;;  %v1164_v46 = vld [vmem:[#allocation7 + $0x1a0] sm:$0xff] }
 0x3ff   : > { %1612 = vmatprep.subr.mxu0 %v764_v47 }
 0x400   : > { %1613 = vmatpush3.msra.mxu0 %v764_v47  ;;  %v1163_v47 = vld [vmem:[#allocation7 + $0x198] sm:$0xff] }
 0x401   : > { %1614 = vmatprep.subr.mxu0 %v763_v48 }
 0x402   : > { %1615 = vmatpush3.msra.mxu0 %v763_v48  ;;  %v1162_v48 = vld [vmem:[#allocation7 + $0x190] sm:$0xff] }
 0x403   : > { %1616 = vmatprep.subr.mxu0 %v762_v49 }
 0x404   : > { %1617 = vmatpush3.msra.mxu0 %v762_v49  ;;  %v1161_v49 = vld [vmem:[#allocation7 + $0x188] sm:$0xff] }
 0x405   : > { %1618 = vmatprep.subr.mxu0 %v761_v57 }
 0x406   : > { %1619 = vmatpush3.msra.mxu0 %v761_v57 }
 0x4b7   : > { %v1584_v51 = vpop.f32.mrf.mxu0 }
 0x4b8   : > { %v748_v52 = vadd.f32 %v1584_v51, %v1403_v50  ;;  %v1412_v51 = vld [vmem:[#allocation7 + $0xe8] ss:$0 sm:$0xff] }
 0x4b9   : > { %v742_v53 = vpop.f32.mrf.mxu0 }
 0x4ba   : > { %v743_v54 = vadd.f32 %v1403_v50, %v742_v53  ;;  %v752_v56 = vmax.f32 %v748_v52, 0.0  ;;  %v1160_v50 = vld [vmem:[#allocation7 + $0x180] sm:$0xff] }
 0x4bc   : > { %v751_v55 = vmax.f32 %v743_v54, 0.0 }
 0x4be   : > { %1601 = vmatprep.mubr.msk.f32.mxu1 %vm445_vm2, %v751_v55 }
 0x4bf   : > { %1602 = vmatmul.mubr.msk.f32.vlgmr.msra.gmra.mxu1 %vm445_vm2, %v752_v56 }
 0x4c0   : > { %1624 = vmatpush3.msra.mxu1 %v2184_v3 }
 0x4c1   : > { %1625 = vmatprep.subr.mxu1 %v2188_v4 }
 0x4c2   : > { %1626 = vmatpush3.msra.mxu1 %v2188_v4 }
 0x4c3   : > { %1627 = vmatprep.subr.mxu1 %v2190_v5 }
 0x4c4   : > { %1628 = vmatpush3.msra.mxu1 %v2190_v5 }
 0x4c5   : > { %1629 = vmatprep.subr.mxu1 %v2194_v6 }
 0x4c6   : > { %1630 = vmatpush3.msra.mxu1 %v2194_v6 }
 0x4c7   : > { %1631 = vmatprep.subr.mxu1 %v2198_v7 }
 0x4c8   : > { %1632 = vmatpush3.msra.mxu1 %v2198_v7 }
 0x4c9   : > { %1633 = vmatprep.subr.mxu1 %v2202_v8 }
 0x4ca   : > { %1634 = vmatpush3.msra.mxu1 %v2202_v8 }
 0x4cb   : > { %1635 = vmatprep.subr.mxu1 %v2206_v9 }
 0x4cc   : > { %1636 = vmatpush3.msra.mxu1 %v2206_v9 }
 0x4cd   : > { %1637 = vmatprep.subr.mxu1 %v2210_v10 }
 0x4ce   : > { %1638 = vmatpush3.msra.mxu1 %v2210_v10 }
 0x4cf   : > { %1661 = vmatprep.subr.mxu1 %v1929_v42 }
 0x57f   : > { %v1603_v58 = vpop.f32.mrf.mxu1 }
 0x580   : > { %v1061_v61 = vmul.f32 %v1603_v58, %v2141_v18  ;;  %v1059_v0 = vmul.f32 %v1603_v58, %v2148_v24  ;;  %v1057_v18 = vmul.f32 %v1603_v58, %v2154_v27 }
 0x581   : > { %v842_v62 = vpop.f32.mrf.mxu1 }
 0x582   : > { %1620 = vmatprep.mubr.msk.f32.mxu0 %vm445_vm2, %v842_v62  ;;  %1642 = vmatprep.subr.mxu0 %v1061_v61  ;;  %v1060_v63 = vmul.f32 %v842_v62, %v2143_v20  ;;  %v1058_v1 = vmul.f32 %v842_v62, %v2151_v25  ;;  %v1056_v2 = vmul.f32 %v842_v62, %v2157_v29 }
 0x583   : > { %1621 = vmatmul.mubr.msk.f32.vlgmr.msra.gmra.mxu0 %vm445_vm2, %v1603_v58  ;;  %v1055_v20 = vmul.f32 %v1603_v58, %v2160_v31  ;;  %v1054_v24 = vmul.f32 %v842_v62, %v2163_v33 }
 0x584   : > { %1643 = vmatpush3.msra.mxu0 %v1061_v61 }
 0x585   : > { %1644 = vmatprep.subr.mxu0 %v1060_v63 }
 0x586   : > { %1645 = vmatpush3.msra.mxu0 %v1060_v63 }
 0x587   : > { %1646 = vmatprep.subr.mxu0 %v1059_v0 }
 0x588   : > { %1647 = vmatpush3.msra.mxu0 %v1059_v0 }
 0x589   : > { %1648 = vmatprep.subr.mxu0 %v1058_v1 }
 0x58a   : > { %1649 = vmatpush3.msra.mxu0 %v1058_v1 }
 0x58b   : > { %1650 = vmatprep.subr.mxu0 %v1057_v18 }
 0x58c   : > { %1651 = vmatpush3.msra.mxu0 %v1057_v18 }
 0x58d   : > { %1652 = vmatprep.subr.mxu0 %v1056_v2 }
 0x58e   : > { %1653 = vmatpush3.msra.mxu0 %v1056_v2 }
 0x58f   : > { %1654 = vmatprep.subr.mxu0 %v1055_v20 }
 0x590   : > { %1655 = vmatpush3.msra.mxu0 %v1055_v20 }
 0x591   : > { %1656 = vmatprep.subr.mxu0 %v1054_v24 }
 0x592   : > { %1657 = vmatpush3.msra.mxu0 %v1054_v24 }
 0x643   : > { %v1622_v25 = vpop.f32.mrf.mxu0 }
 0x644   : > { %v933_v3 = vmul.f32 %v1622_v25, %v2169_v39 }
 0x645   : > { %v923_v4 = vpop.f32.mrf.mxu0 }
 0x646   : > { %v932_v27 = vmul.f32 %v923_v4, %v2167_v36  ;;  %v935_v5 = vsel %vm537_vm3, %v933_v3, 0.0 }
 0x648   : > { %v934_v29 = vsel %vm537_vm3, %v932_v27, 0.0 }
 0x649   : > { %v936_v6 = vadd.f32 %v935_v5, %v934_v29 }
 0x64b   : > { %v937_v7 = vrot.slane %v936_v6, 4 }
 0x64d   : > { %v938_v31 = vadd.f32 %v937_v7, %v936_v6 }
 0x64f   : > { %v939_v8 = vrot.slane %v938_v31, 2 }
 0x651   : > { %v940_v9 = vadd.f32 %v939_v8, %v938_v31 }
 0x653   : > { %v941_v10 = vrot.slane %v940_v9, 1 }
 0x655   : > { %v942_v33 = vadd.f32 %v941_v10, %v940_v9 }
 0x657   : > { %944 = vrot.lane.b32.xlu0 %v942_v33, %s1927_s18 }
 0x6c9   : > { %v945_v11 = vpop.permute.xlu0 %944 }
 0x6ca   : > { %v947_v12 = vadd.f32 %v945_v11, %v923_v4  ;;  %v948_v13 = vadd.f32 %v1622_v25, %v945_v11  ;;  %v1168_v25 = vld [vmem:[#allocation7 + $0x1c0] sm:$0x7] }
 0x6cc   : > { %vm949_vm8 = vcmp.ge.f32.partialorder %v947_v12, 0.0  ;;  %vm950_vm9 = vcmp.ge.f32.partialorder %v948_v13, 0.0  ;;  %v951_v39 = vmul.f32 0.2, %v947_v12  ;;  %v952_v36 = vmul.f32 0.2, %v948_v13 }
 0x6ce   : > { %v953_v14 = vsel %vm949_vm8, %v947_v12, %v951_v39  ;;  %v954_v15 = vsel %vm950_vm9, %v948_v13, %v952_v36  ;;  %v1265_v13 = vrot.slane %v1168_v25, 1 }
 0x6cf   : > { %v955_v16 = vadd.f32 %v953_v14, %v2178_v60  ;;  %v956_v19 = vadd.f32 %v954_v15, %v2176_v59 }
 0x6d1   : > { %v957_v17 = vsel %vm445_vm2, %v955_v16, -inf  ;;  %v960_v21 = vsel %vm445_vm2, %v956_v19, -inf }
 0x6d2   : > { %958 = vmax.xlane.f32.xlu1 %v957_v17 }
 0x6d6   : > { %961 = vmax.xlane.f32.xlu1 %v960_v21 }
 0x75b   : > { %v959_v22 = vpop.xlane.xlu1 %958 }
 0x75c   : > { %v963_v23 = vsub.f32 %v955_v16, %v959_v22 }
 0x75e   : > { %v965_v26 = vmul.f32 1.442695, %v963_v23 }
 0x75f   : > { %v962_v28 = vpop.xlane.xlu1 %961 }
 0x760   : > { %1756 = vpow2.f32 %v965_v26  ;;  %v964_v30 = vsub.f32 %v956_v19, %v962_v28 }
 0x762   : > { %v967_v32 = vmul.f32 1.442695, %v964_v30 }
 0x764   : > { %1758 = vpow2.f32 %v967_v32 }
 0x76d   : > { %v1757_v34 = vpop.eup %1756 }
 0x76e   : > { %1639 = vmatprep.mubr.msk.f32.mxu1 %vm445_vm2, %v1757_v34 }
 0x771   : > { %v1759_v60 = vpop.eup %1758 }
 0x772   : > { %1640 = vmatmul.mubr.msk.f32.vlgmr.msra.gmra.mxu1 %vm445_vm2, %v1759_v60 }
 0x773   : > { %1662 = vmatpush3.msra.mxu1 %v1167_v43  ;;  %1677 = vmatprep.mubr.msk.f32.mxu1 %vm1930_vm10, %v1929_v42 }
 0x774   : > { %1663 = vmatprep.subr.mxu1 %v1929_v42 }
 0x775   : > { %1664 = vmatpush3.msra.mxu1 %v1166_v44 }
 0x776   : > { %1665 = vmatprep.subr.mxu1 %v1929_v42 }
 0x777   : > { %1666 = vmatpush3.msra.mxu1 %v1165_v45 }
 0x778   : > { %1667 = vmatprep.subr.mxu1 %v1929_v42 }
 0x779   : > { %1668 = vmatpush3.msra.mxu1 %v1164_v46 }
 0x77a   : > { %1669 = vmatprep.subr.mxu1 %v1929_v42 }
 0x77b   : > { %1670 = vmatpush3.msra.mxu1 %v1163_v47 }
 0x77c   : > { %1671 = vmatprep.subr.mxu1 %v1929_v42 }
 0x77d   : > { %1672 = vmatpush3.msra.mxu1 %v1162_v48 }
 0x77e   : > { %1673 = vmatprep.subr.mxu1 %v1929_v42 }
 0x77f   : > { %1674 = vmatpush3.msra.mxu1 %v1161_v49 }
 0x780   : > { %1675 = vmatprep.subr.mxu1 %v1929_v42 }
 0x781   : > { %1676 = vmatpush3.msra.mxu1 %v1160_v50 }
 0x832   : > { %v1641_v35 = vpop.f32.mrf.mxu1 }
 0x833   : > { %1760 = vrcp.f32 %v1641_v35 }
 0x834   : > { %v1041_v59 = vpop.f32.mrf.mxu1 }
 0x835   : > { %1762 = vrcp.f32 %v1041_v59 }
 0x840   : > { %v1761_v37 = vpop.eup %1760 }
 0x841   : > { %v1053_v41 = vmul.f32 %v1761_v37, %v1759_v60 }
 0x842   : > { %v1763_v38 = vpop.eup %1762 }
 0x843   : > { %v1052_v40 = vmul.f32 %v1763_v38, %v1757_v34 }
 0x845   : > { %1658 = vmatprep.mubr.msk.f32.mxu0 %vm445_vm2, %v1052_v40 }
 0x846   : > { %1659 = vmatmul.mubr.msk.f32.vlgmr.msra.gmra.mxu0 %vm445_vm2, %v1053_v41 }
 0x906   : > { %v1660_v52 = vpop.f32.mrf.mxu0 }
 0x907   : > { %v1144_v53 = vadd.f32 %v1660_v52, %v1412_v51 }
 0x908   : > { %v1138_v54 = vpop.f32.mrf.mxu0 }
 0x909   : > { %v1148_v55 = vmax.f32 %v1144_v53, 0.0  ;;  %v1139_v56 = vadd.f32 %v1412_v51, %v1138_v54 }
 0x90b   : > { %v1147_v57 = vmax.f32 %v1139_v56, 0.0  ;;  %v1150_v58 = vsel %vm445_vm2, %v1148_v55, 0.0 }
 0x90d   : > { %v1149_v61 = vsel %vm445_vm2, %v1147_v57, 0.0 }
 0x90e   : > { %v1151_v62 = vadd.f32 %v1150_v58, %v1149_v61 }
 0x910   : > { %v1152_v63 = vrot.slane %v1151_v62, 4 }
 0x912   : > { %v1153_v0 = vadd.f32 %v1152_v63, %v1151_v62 }
 0x914   : > { %v1154_v1 = vrot.slane %v1153_v0, 2 }
 0x916   : > { %v1155_v18 = vadd.f32 %v1154_v1, %v1153_v0 }
 0x918   : > { %v1156_v2 = vrot.slane %v1155_v18, 1 }
 0x91a   : > { %v1157_v20 = vadd.f32 %v1156_v2, %v1155_v18 }
 0x91c   : > { %v1159_v24 = vmul.f32 0.0625, %v1157_v20 }
 0x91e   : > { %1678 = vmatmul.mubr.msk.f32.vlgmr.msra.gmra.mxu1 %vm445_vm2, %v1159_v24 }
 0x9de   : > { %v1238_v3 = vpop.f32.mrf.mxu1 }
 0x9df   : > { %v1239_v4 = vadd.f32 %v1238_v3, %v1168_v25 }
 0x9e0   : > { %v1679_v27 = vpop.f32.mrf.mxu1 }
 0x9e1   : > { %v1243_v5 = vsel %vm1242_vm11, %v1239_v4, 0.0 }
 0x9e2   : > { %1244 = vadd.xlane.f32.xlu1 %v1243_v5 }
 0xa6b   : > { %v1245_v29 = vpop.xlane.xlu1 %1244 }
 0xa6c   : > { %v1247_v6 = vmul.f32 0.03125, %v1245_v29 }
 0xa6e   : > { %v1248_v7 = vsub.f32 %v1239_v4, %v1247_v6 }
 0xa70   : > { %v1249_v31 = vmul.f32 %v1248_v7, %v1248_v7  ;;  %v1255_v11 = vrot.slane %v1248_v7, 7 }
 0xa72   : > { %v1250_v8 = vsel %vm1242_vm11, %v1249_v31, 0.0  ;;  %v1257_v39 = vmul.f32 %v1255_v11, %v1168_v25 }
 0xa73   : > { %1251 = vadd.xlane.f32.xlu1 %v1250_v8 }
 0xafc   : > { %v1252_v9 = vpop.xlane.xlu1 %1251 }
 0xafd   : > { %v1253_v10 = vmul.f32 0.03125, %v1252_v9 }
 0xaff   : > { %v1258_v33 = vadd.f32 1e-05, %v1253_v10 }
 0xb01   : > { %1764 = vrsqrt.f32 %v1258_v33 }
 0xb0e   : > { %v1765_v12 = vpop.eup %1764 }
 0xb0f   : > { %v1261_v36 = vrot.slane %v1765_v12, 7 }
 0xb11   : > { %v1263_v14 = vmul.f32 %v1261_v36, %v1257_v39 }
 0xb13   : > { %v1267_v15 = vadd.f32 %v1265_v13, %v1263_v14 }
 0xb15   : > { %1269 = vst.msk [vmem:[%s241_s29 - $0x1] sm:$0x2] %vm1268_vm12, %v1267_v15 }
 0xb16   : > { %1861 = shalt.err (!%p1858_p11)
}
 0xb17   : > { %s1862_s22 = scalar_lea.hbm %s1281_s8, 16  ;;  %s1866_s2 = scalar_lea.hbm %s2302_s3, 128 }
 0xb18   : > { %p1863_p1 = scmp.ne.s32.totalorder %s1281_s8, %s1862_s22  ;;  %p1867_p7 = scmp.lt.s32.totalorder %s1281_s8, %s2302_s3 }
 0xb19   : > { %p1868_p8 = scmp.lt.s32.totalorder %s1866_s2, %s1862_s22 }
 0xb1a   : > { %p1864_p4 = pnand %p1863_p1, %p2326_p9 }
 0xb1b   : > { %p1869_p10 = por %p1868_p8, %p1867_p7 }
 0xb1c   : > { %p1865_p3 = pneg %p1864_p4 }
 0xb1e   : > { %p1870_p6 = pnand %p1869_p10, %p1865_p3 }
 0xb20   : > { %1873 = shalt.err (!%p1870_p6)
}
 0xb21   : > { %1688 = dma.vmem_to_hbm [thread:$0]  (%p2326_p9), %s1284_s10, 16, %s1281_s8, %s1271_s25  }
 0xb22 PF: > { %p1708_p12 = scmp.ge.s32.totalorder %s1920_s15, 2  ;;  %s1295_s23 = sand.u32 1, %s1908_s12  }
 0xb23   : > { %p2327_p13 = scmp.ne.s32.totalorder %s2313_s19, 0  ;;  %s1296_s20 = scalar_lea.sflag [#allocation4], %s1295_s23 }
 0xb25   : > { %p1702_p0 = pnand %p1708_p12, %p2327_p13 }
 0xb27   : > { %p1703_p5 = pneg %p1702_p0 }
 0xb29   : > { %1903 = dma.done.wait (%p1703_p5), %s1296_s20, 16  }
 0xb2a   : > { %1905 = vsyncadd (%p1703_p5), %s1296_s20, 4294967280  ;;  %p19_p2 = scmp.ge.s32.totalorder %s2005_s24, 10   ;;  %s2328_s12 = smov %s1912_s13 }
 0xb2b   : > { %s2329_s13 = smov %s1916_s14  ;;  %s2330_s14 = smov %s2025_s5 }
 0xb2c   : > { %s2331_s15 = smov %s2005_s24  ;;  %21 = sbr.rel (!%p19_p2) target bundleno = 10 (0xa), region = 94 }
 0xb31   :  { %1300 = vsyncpa [#allocation3], 1 }
 0xb32   :  { %1302 = vsyncpa [#allocation3 + $0x1], 1 }
 0xb33   :  { %1303 = vsyncpa [#allocation6], 1 }
 0xb34   :  { %1305 = vsyncpa [#allocation6 + $0x1], 1 }
 0xb35   :  { %1306 = vsyncpa [#allocation4], 1 }
 0xb36   :  { %1308 = vsyncpa [#allocation4 + $0x1], 1 }

</bundles_post_ra>
